<compile_context>
chip_gen: v6e
topology: v6e:2x2x1
jax: 0.10.0
libtpu: 0.0.40
codegen_flags: <defaults>
</compile_context>

<pallas_src>
import functools

import jax
import jax.numpy as jnp
import numpy as np
from jax.experimental import pallas as pl
from jax.experimental.pallas import tpu as pltpu


def _round_up(a, b):
    return (a + b - 1) // b * b


def _attn_kernel(x_ref, wq_ref, wk_ref, wv_ref, wo_ref, bo_ref, out_ref,
                 k_scr, v_scr, *, heads, dim_head, q_tile, s_valid, s_pad):
    cdt = x_ref.dtype                      # MXU operand dtype (bf16 stays bf16)
    qi = pl.program_id(1)

    # ---- K/V projection cached ONCE per batch (qi is the innermost axis) ----
    @pl.when(qi == 0)
    def _cache_kv():
        x_all = x_ref[...]                 # (S_pad, D), VMEM-resident per batch
        # Static loop: each (S_pad, dh) chunk is stored to scratch immediately,
        # so live ranges stay bounded and no (S_pad, H*dh) f32 slab exists.
        for h in range(heads):
            k_scr[h] = jnp.dot(x_all, wk_ref[h],
                               preferred_element_type=jnp.float32).astype(k_scr.dtype)
            v_scr[h] = jnp.dot(x_all, wv_ref[h],
                               preferred_element_type=jnp.float32).astype(v_scr.dtype)

    # ---- query rows sliced from the already-resident full-sequence block ----
    q_start = pl.multiple_of(qi * q_tile, q_tile)
    x_q = x_ref[pl.ds(q_start, q_tile), :]                         # (Tq, D)

    # Additive key mask for the padded sequence tail (static python check;
    # compiled away entirely when S is already a multiple of the tile).
    if s_pad != s_valid:
        col = jax.lax.broadcasted_iota(jnp.int32, (1, s_pad), 1)
        neg_mask = jnp.where(col < s_valid, 0.0, -1e30).astype(jnp.float32)
    else:
        neg_mask = None

    dq = out_ref.shape[-1]

    # ---- per-head attention, output projection accumulated per head --------
    def head_body(h, acc):
        # Q projection of this query tile only (softmax scale already folded
        # into wq in the wrapper -> no per-score scaling pass).
        qh = jnp.dot(x_q, wq_ref[h],
                     preferred_element_type=jnp.float32).astype(cdt)   # (Tq, dh)
        kh = k_scr[h]                                                  # (S_pad, dh)
        vh = v_scr[h]                                                  # (S_pad, dh)

        # scores = q @ k^T without materialising the transpose.
        scores = jax.lax.dot_general(
            qh, kh, dimension_numbers=(((1,), (1,)), ((), ())),
            preferred_element_type=jnp.float32)                       # (Tq, S_pad)
        if neg_mask is not None:
            scores = scores + neg_mask

        m = jnp.max(scores, axis=-1, keepdims=True)
        p = jnp.exp(scores - m)
        l = jnp.sum(p, axis=-1, keepdims=True)
        p = p * pl.reciprocal(l, approx=True)                         # EUP, ~free

        ctx = jnp.dot(p.astype(cdt), vh,
                      preferred_element_type=jnp.float32).astype(cdt)  # (Tq, dh)
        # Accumulated output projection: no concat, no H live ctx slabs.
        return acc + jnp.dot(ctx, wo_ref[h],
                             preferred_element_type=jnp.float32)       # (Tq, Dq)

    acc0 = jnp.zeros((q_tile, dq), jnp.float32)
    acc = jax.lax.fori_loop(0, heads, head_body, acc0, unroll=2)

    out_ref[...] = (acc + bo_ref[...].astype(jnp.float32)).astype(out_ref.dtype)


def animation_attention(x, wq, wk, wv, wo, bo, *, heads, dim_head, scale,
                        q_tile=None):
    B, S, D = x.shape
    hdh = heads * dim_head
    Dq = wo.shape[-1]
    assert wq.shape == (D, hdh) and wk.shape == (D, hdh) and wv.shape == (D, hdh)
    assert wo.shape == (hdh, Dq) and bo.shape == (Dq,)

    # Head-major weight layout so per-head operands are addressed on the
    # leading axis (no sub-128-lane slicing inside the kernel).  The softmax
    # scale is folded into wq here (one-time constant transform of a tiny
    # weight -> zero in-kernel cost, equivalent to scaling q).
    wq_hm = (wq * scale).reshape(D, heads, dim_head).transpose(1, 0, 2)
    wk_hm = wk.reshape(D, heads, dim_head).transpose(1, 0, 2)
    wv_hm = wv.reshape(D, heads, dim_head).transpose(1, 0, 2)
    wo_hm = wo.reshape(heads, dim_head, Dq)
    bo2 = bo.reshape(1, Dq)

    # Generation-aware tiling / VMEM budget (v7x has 64 MiB per-TC VMEM,
    # v5e/v6e have 128 MiB).
    try:
        vmem_cap = int(pltpu.get_tpu_info().vmem_capacity_bytes)
        vmem_limit = min(96 * 1024 * 1024, (vmem_cap * 5) // 8)
        default_tile = 256 if vmem_cap <= 64 * 1024 * 1024 else 512
    except Exception:
        vmem_limit = 48 * 1024 * 1024      # conservative, works on all parts
        default_tile = 256
    if q_tile is None:
        q_tile = default_tile
    # Never exceed the (sublane-padded) sequence; pad S up to a tile multiple
    # instead of silently collapsing to a single (S, S) tile.
    q_tile = min(q_tile, _round_up(S, 8))
    s_pad = _round_up(S, q_tile)
    num_q = s_pad // q_tile

    x_in = x if s_pad == S else jnp.pad(x, ((0, 0), (0, s_pad - S), (0, 0)))

    kernel = functools.partial(_attn_kernel, heads=heads, dim_head=dim_head,
                               q_tile=q_tile, s_valid=S, s_pad=s_pad)

    out = pl.pallas_call(
        kernel,
        out_shape=jax.ShapeDtypeStruct((B, s_pad, Dq), x.dtype),
        grid_spec=pltpu.PrefetchScalarGridSpec(
            num_scalar_prefetch=0,
            grid=(B, num_q),
            in_specs=[
                # Full-sequence x: block index depends only on b, so it is
                # DMA'd from HBM once per batch and reused across query tiles.
                pl.BlockSpec((None, s_pad, D), lambda b, qi: (b, 0, 0)),
                # Weights: constant block index -> fetched once, VMEM-resident.
                pl.BlockSpec((heads, D, dim_head), lambda b, qi: (0, 0, 0)),   # wq
                pl.BlockSpec((heads, D, dim_head), lambda b, qi: (0, 0, 0)),   # wk
                pl.BlockSpec((heads, D, dim_head), lambda b, qi: (0, 0, 0)),   # wv
                pl.BlockSpec((heads, dim_head, Dq), lambda b, qi: (0, 0, 0)),  # wo
                pl.BlockSpec((1, Dq), lambda b, qi: (0, 0)),                   # bo
            ],
            out_specs=pl.BlockSpec((None, q_tile, Dq), lambda b, qi: (b, qi, 0)),
            scratch_shapes=[
                pltpu.VMEM((heads, s_pad, dim_head), x.dtype),   # K cache
                pltpu.VMEM((heads, s_pad, dim_head), x.dtype),   # V cache
            ],
        ),
        compiler_params=pltpu.CompilerParams(
            # qi must be "arbitrary": the K/V scratch cached at qi == 0 is
            # reused by the later query tiles of the same batch.
            dimension_semantics=("parallel", "arbitrary"),
            vmem_limit_bytes=vmem_limit),
    )(x_in, wq_hm, wk_hm, wv_hm, wo_hm, bo2)

    return out if s_pad == S else out[:, :S, :]


def reference_attention(x, wq, wk, wv, wo, bo, *, heads, scale):
    """Pure-JAX reference mirroring the PyTorch AnimationAttention.forward."""
    B, S, D = x.shape
    dh = wq.shape[1] // heads

    def split(t):
        return t.reshape(B, S, heads, dh).transpose(0, 2, 1, 3)     # (B, H, S, dh)

    q = split(x @ wq)
    k = split(x @ wk)
    v = split(x @ wv)
    scores = jnp.einsum("bhqd,bhkd->bhqk", q, k) * scale
    probs = jax.nn.softmax(scores, axis=-1)
    ctx = jnp.einsum("bhqk,bhkd->bhqd", probs, v)
    ctx = ctx.transpose(0, 2, 1, 3).reshape(B, S, heads * dh)
    return ctx @ wo + bo.reshape(1, 1, -1)


if __name__ == "__main__":
    # Small shapes consistent with the module: query_dim=32, heads=2,
    # dim_head=16 (hidden_size = 32).
    query_dim, heads, dim_head = 32, 2, 16
    hdh = heads * dim_head
    scale = dim_head ** (-0.5)

    key = jax.random.PRNGKey(0)
    kx, kq, kk, kv, ko, kb, kx2 = jax.random.split(key, 7)

    # nn.Linear weights, pre-transposed (to_q/to_k/to_v bias-free, to_out biased).
    wq = jax.random.normal(kq, (query_dim, hdh), dtype=jnp.float32) * 0.05
    wk = jax.random.normal(kk, (query_dim, hdh), dtype=jnp.float32) * 0.05
    wv = jax.random.normal(kv, (query_dim, hdh), dtype=jnp.float32) * 0.05
    wo = jax.random.normal(ko, (hdh, query_dim), dtype=jnp.float32) * 0.05
    bo = jax.random.normal(kb, (query_dim,), dtype=jnp.float32) * 0.05

    # Case 1: batch=2, seq=8 (single query tile, no padding).
    x1 = jax.random.normal(kx, (2, 8, query_dim), dtype=jnp.float32)
    out1 = jax.block_until_ready(
        animation_attention(x1, wq, wk, wv, wo, bo,
                            heads=heads, dim_head=dim_head, scale=scale))
    ref1 = reference_attention(x1, wq, wk, wv, wo, bo, heads=heads, scale=scale)
    # Tolerance loosened vs. 1e-5 because the softmax normalisation uses the
    # EUP approximate reciprocal.
    np.testing.assert_allclose(np.asarray(out1), np.asarray(ref1),
                               rtol=2e-3, atol=2e-3)

    # Case 2: seq=12 with forced q_tile=8 -> exercises multi-query-tile grids,
    # the per-batch cached K/V scratch reuse, and the padded-key masking.
    x2 = jax.random.normal(kx2, (2, 12, query_dim), dtype=jnp.float32)
    out2 = jax.block_until_ready(
        animation_attention(x2, wq, wk, wv, wo, bo,
                            heads=heads, dim_head=dim_head, scale=scale,
                            q_tile=8))
    ref2 = reference_attention(x2, wq, wk, wv, wo, bo, heads=heads, scale=scale)
    np.testing.assert_allclose(np.asarray(out2), np.asarray(ref2),
                               rtol=2e-3, atol=2e-3)

    print("KERNEL_OK")
</pallas_src>

<mosaic_0001>
module attributes {stable_mosaic.version = 11 : i64} {
  func.func @_attn_kernel(%arg0: i32, %arg1: i32, %arg2: memref<1x8x32xf32, #tpu.memory_space<vmem>>, %arg3: memref<2x32x16xf32, #tpu.memory_space<vmem>>, %arg4: memref<2x32x16xf32, #tpu.memory_space<vmem>>, %arg5: memref<2x32x16xf32, #tpu.memory_space<vmem>>, %arg6: memref<2x16x32xf32, #tpu.memory_space<vmem>>, %arg7: memref<1x32xf32, #tpu.memory_space<vmem>>, %arg8: memref<1x8x32xf32, #tpu.memory_space<vmem>>, %arg9: memref<2x8x16xf32, #tpu.memory_space<vmem>>, %arg10: memref<2x8x16xf32, #tpu.memory_space<vmem>>) attributes {dimension_semantics = [#tpu.dimension_semantics<parallel>, #tpu.dimension_semantics<arbitrary>], iteration_bounds = array<i64: 2, 1>, scalar_prefetch = 0 : i64, scratch_operands = 2 : i64, tpu.core_type = #tpu.core_type<tc>, window_params = [{transform_indices = @transform_0, window_bounds = array<i64: 1, 8, 32>}, {pipeline_mode = #tpu.pipeline_mode<synchronous>, transform_indices = @transform_1, window_bounds = array<i64: 2, 32, 16>}, {pipeline_mode = #tpu.pipeline_mode<synchronous>, transform_indices = @transform_2, window_bounds = array<i64: 2, 32, 16>}, {pipeline_mode = #tpu.pipeline_mode<synchronous>, transform_indices = @transform_3, window_bounds = array<i64: 2, 32, 16>}, {pipeline_mode = #tpu.pipeline_mode<synchronous>, transform_indices = @transform_4, window_bounds = array<i64: 2, 16, 32>}, {pipeline_mode = #tpu.pipeline_mode<synchronous>, transform_indices = @transform_5, window_bounds = array<i64: 1, 32>}, {transform_indices = @transform_6, window_bounds = array<i64: 1, 8, 32>}]} {
    %c0_i32 = arith.constant 0 : i32
    %0 = arith.cmpi eq, %arg1, %c0_i32 : i32
    %1 = arith.extui %0 : i1 to i32
    %c0_i32_0 = arith.constant 0 : i32
    %2 = arith.cmpi ne, %1, %c0_i32_0 : i32
    scf.if %2 {
      %c0_36 = arith.constant 0 : index
      %c0_37 = arith.constant 0 : index
      %c0_38 = arith.constant 0 : index
      %69 = vector.load %arg2[%c0_36, %c0_37, %c0_38] : memref<1x8x32xf32, #tpu.memory_space<vmem>>, vector<1x8x32xf32>
      %70 = vector.shape_cast %69 : vector<1x8x32xf32> to vector<8x32xf32>
      %c0_39 = arith.constant 0 : index
      %c0_40 = arith.constant 0 : index
      %c0_41 = arith.constant 0 : index
      %71 = vector.load %arg4[%c0_39, %c0_40, %c0_41] : memref<2x32x16xf32, #tpu.memory_space<vmem>>, vector<1x32x16xf32>
      %72 = vector.shape_cast %71 : vector<1x32x16xf32> to vector<32x16xf32>
      %cst_42 = arith.constant dense<0.000000e+00> : vector<8x16xf32>
      %73 = tpu.matmul %70, %72, %cst_42 {dimension_numbers = #tpu.dot_dimension_numbers<[1], [0], [0], [1], [0, 0, 1, 1], [], []>} : vector<8x32xf32>, vector<32x16xf32>, vector<8x16xf32> -> vector<8x16xf32>
      %c0_43 = arith.constant 0 : index
      %c0_44 = arith.constant 0 : index
      %c0_45 = arith.constant 0 : index
      %74 = vector.load %arg9[%c0_43, %c0_44, %c0_45] : memref<2x8x16xf32, #tpu.memory_space<vmem>>, vector<1x8x16xf32>
      %75 = vector.shape_cast %74 : vector<1x8x16xf32> to vector<8x16xf32>
      %76 = vector.shape_cast %73 : vector<8x16xf32> to vector<1x8x16xf32>
      tpu.vector_store %arg9[%c0_43, %c0_44, %c0_45], %76 {strides = array<i32>} : memref<2x8x16xf32, #tpu.memory_space<vmem>>, vector<1x8x16xf32>,
      %c0_46 = arith.constant 0 : index
      %c0_47 = arith.constant 0 : index
      %c0_48 = arith.constant 0 : index
      %77 = vector.load %arg5[%c0_46, %c0_47, %c0_48] : memref<2x32x16xf32, #tpu.memory_space<vmem>>, vector<1x32x16xf32>
      %78 = vector.shape_cast %77 : vector<1x32x16xf32> to vector<32x16xf32>
      %cst_49 = arith.constant dense<0.000000e+00> : vector<8x16xf32>
      %79 = tpu.matmul %70, %78, %cst_49 {dimension_numbers = #tpu.dot_dimension_numbers<[1], [0], [0], [1], [0, 0, 1, 1], [], []>} : vector<8x32xf32>, vector<32x16xf32>, vector<8x16xf32> -> vector<8x16xf32>
      %c0_50 = arith.constant 0 : index
      %c0_51 = arith.constant 0 : index
      %c0_52 = arith.constant 0 : index
      %80 = vector.load %arg10[%c0_50, %c0_51, %c0_52] : memref<2x8x16xf32, #tpu.memory_space<vmem>>, vector<1x8x16xf32>
      %81 = vector.shape_cast %80 : vector<1x8x16xf32> to vector<8x16xf32>
      %82 = vector.shape_cast %79 : vector<8x16xf32> to vector<1x8x16xf32>
      tpu.vector_store %arg10[%c0_50, %c0_51, %c0_52], %82 {strides = array<i32>} : memref<2x8x16xf32, #tpu.memory_space<vmem>>, vector<1x8x16xf32>,
      %c1 = arith.constant 1 : index
      %c0_53 = arith.constant 0 : index
      %c0_54 = arith.constant 0 : index
      %83 = vector.load %arg4[%c1, %c0_53, %c0_54] : memref<2x32x16xf32, #tpu.memory_space<vmem>>, vector<1x32x16xf32>
      %84 = vector.shape_cast %83 : vector<1x32x16xf32> to vector<32x16xf32>
      %cst_55 = arith.constant dense<0.000000e+00> : vector<8x16xf32>
      %85 = tpu.matmul %70, %84, %cst_55 {dimension_numbers = #tpu.dot_dimension_numbers<[1], [0], [0], [1], [0, 0, 1, 1], [], []>} : vector<8x32xf32>, vector<32x16xf32>, vector<8x16xf32> -> vector<8x16xf32>
      %c1_56 = arith.constant 1 : index
      %c0_57 = arith.constant 0 : index
      %c0_58 = arith.constant 0 : index
      %86 = vector.load %arg9[%c1_56, %c0_57, %c0_58] : memref<2x8x16xf32, #tpu.memory_space<vmem>>, vector<1x8x16xf32>
      %87 = vector.shape_cast %86 : vector<1x8x16xf32> to vector<8x16xf32>
      %88 = vector.shape_cast %85 : vector<8x16xf32> to vector<1x8x16xf32>
      tpu.vector_store %arg9[%c1_56, %c0_57, %c0_58], %88 {strides = array<i32>} : memref<2x8x16xf32, #tpu.memory_space<vmem>>, vector<1x8x16xf32>,
      %c1_59 = arith.constant 1 : index
      %c0_60 = arith.constant 0 : index
      %c0_61 = arith.constant 0 : index
      %89 = vector.load %arg5[%c1_59, %c0_60, %c0_61] : memref<2x32x16xf32, #tpu.memory_space<vmem>>, vector<1x32x16xf32>
      %90 = vector.shape_cast %89 : vector<1x32x16xf32> to vector<32x16xf32>
      %cst_62 = arith.constant dense<0.000000e+00> : vector<8x16xf32>
      %91 = tpu.matmul %70, %90, %cst_62 {dimension_numbers = #tpu.dot_dimension_numbers<[1], [0], [0], [1], [0, 0, 1, 1], [], []>} : vector<8x32xf32>, vector<32x16xf32>, vector<8x16xf32> -> vector<8x16xf32>
      %c1_63 = arith.constant 1 : index
      %c0_64 = arith.constant 0 : index
      %c0_65 = arith.constant 0 : index
      %92 = vector.load %arg10[%c1_63, %c0_64, %c0_65] : memref<2x8x16xf32, #tpu.memory_space<vmem>>, vector<1x8x16xf32>
      %93 = vector.shape_cast %92 : vector<1x8x16xf32> to vector<8x16xf32>
      %94 = vector.shape_cast %91 : vector<8x16xf32> to vector<1x8x16xf32>
      tpu.vector_store %arg10[%c1_63, %c0_64, %c0_65], %94 {strides = array<i32>} : memref<2x8x16xf32, #tpu.memory_space<vmem>>, vector<1x8x16xf32>,
    } else {
    }
    %c8_i32 = arith.constant 8 : i32
    %3 = arith.muli %arg1, %c8_i32 : i32
    %4 = tpu.assume_multiple %3, 8 : i32
    %c0 = arith.constant 0 : index
    %5 = arith.index_cast %4 : i32 to index
    %c0_1 = arith.constant 0 : index
    %6 = vector.load %arg2[%c0, %5, %c0_1] : memref<1x8x32xf32, #tpu.memory_space<vmem>>, vector<1x8x32xf32>
    %7 = vector.shape_cast %6 : vector<1x8x32xf32> to vector<8x32xf32>
    %cst = arith.constant 0.000000e+00 : f32
    %8 = vector.broadcast %cst : f32 to vector<8x32xf32>
    %c0_i32_2 = arith.constant 0 : i32
    %9 = arith.index_cast %c0_i32_2 : i32 to index
    %c0_3 = arith.constant 0 : index
    %c0_4 = arith.constant 0 : index
    %10 = vector.load %arg3[%9, %c0_3, %c0_4] : memref<2x32x16xf32, #tpu.memory_space<vmem>>, vector<1x32x16xf32>
    %11 = vector.shape_cast %10 : vector<1x32x16xf32> to vector<32x16xf32>
    %cst_5 = arith.constant dense<0.000000e+00> : vector<8x16xf32>
    %12 = tpu.matmul %7, %11, %cst_5 {dimension_numbers = #tpu.dot_dimension_numbers<[1], [0], [0], [1], [0, 0, 1, 1], [], []>} : vector<8x32xf32>, vector<32x16xf32>, vector<8x16xf32> -> vector<8x16xf32>
    %13 = arith.index_cast %c0_i32_2 : i32 to index
    %c0_6 = arith.constant 0 : index
    %c0_7 = arith.constant 0 : index
    %14 = vector.load %arg9[%13, %c0_6, %c0_7] : memref<2x8x16xf32, #tpu.memory_space<vmem>>, vector<1x8x16xf32>
    %15 = vector.shape_cast %14 : vector<1x8x16xf32> to vector<8x16xf32>
    %16 = arith.index_cast %c0_i32_2 : i32 to index
    %c0_8 = arith.constant 0 : index
    %c0_9 = arith.constant 0 : index
    %17 = vector.load %arg10[%16, %c0_8, %c0_9] : memref<2x8x16xf32, #tpu.memory_space<vmem>>, vector<1x8x16xf32>
    %18 = vector.shape_cast %17 : vector<1x8x16xf32> to vector<8x16xf32>
    %cst_10 = arith.constant dense<0.000000e+00> : vector<8x8xf32>
    %19 = tpu.matmul %12, %15, %cst_10 {dimension_numbers = #tpu.dot_dimension_numbers<[1], [1], [0], [0], [0, 0, 1, 0], [], []>} : vector<8x16xf32>, vector<8x16xf32>, vector<8x8xf32> -> vector<8x8xf32>
    %cst_11 = arith.constant dense<0xFF800000> : vector<8xf32>
    %20 = vector.multi_reduction <maximumf>, %19, %cst_11 [1] : vector<8x8xf32> to vector<8xf32>
    %21 = vector.shape_cast %20 : vector<8xf32> to vector<8x1xf32>
    %22 = vector.broadcast %21 : vector<8x1xf32> to vector<8x8xf32>
    %23 = arith.subf %19, %22 : vector<8x8xf32>
    %24 = math.exp %23 : vector<8x8xf32>
    %cst_12 = arith.constant dense<0.000000e+00> : vector<8xf32>
    %25 = vector.multi_reduction <add>, %24, %cst_12 [1] : vector<8x8xf32> to vector<8xf32>
    %26 = vector.shape_cast %25 : vector<8xf32> to vector<8x1xf32>
    %27 = tpu.reciprocal %26 {approx = true} : vector<8x1xf32> -> vector<8x1xf32>
    %28 = vector.broadcast %27 : vector<8x1xf32> to vector<8x8xf32>
    %29 = arith.mulf %24, %28 : vector<8x8xf32>
    %cst_13 = arith.constant dense<0.000000e+00> : vector<8x16xf32>
    %30 = tpu.matmul %29, %18, %cst_13 {dimension_numbers = #tpu.dot_dimension_numbers<[1], [0], [0], [1], [0, 0, 1, 1], [], []>} : vector<8x8xf32>, vector<8x16xf32>, vector<8x16xf32> -> vector<8x16xf32>
    %31 = arith.index_cast %c0_i32_2 : i32 to index
    %c0_14 = arith.constant 0 : index
    %c0_15 = arith.constant 0 : index
    %32 = vector.load %arg6[%31, %c0_14, %c0_15] : memref<2x16x32xf32, #tpu.memory_space<vmem>>, vector<1x16x32xf32>
    %33 = vector.shape_cast %32 : vector<1x16x32xf32> to vector<16x32xf32>
    %cst_16 = arith.constant dense<0.000000e+00> : vector<8x32xf32>
    %34 = tpu.matmul %30, %33, %cst_16 {dimension_numbers = #tpu.dot_dimension_numbers<[1], [0], [0], [1], [0, 0, 1, 1], [], []>} : vector<8x16xf32>, vector<16x32xf32>, vector<8x32xf32> -> vector<8x32xf32>
    %35 = arith.addf %8, %34 : vector<8x32xf32>
    %c1_i32 = arith.constant 1 : i32
    %36 = arith.index_cast %c1_i32 : i32 to index
    %c0_17 = arith.constant 0 : index
    %c0_18 = arith.constant 0 : index
    %37 = vector.load %arg3[%36, %c0_17, %c0_18] : memref<2x32x16xf32, #tpu.memory_space<vmem>>, vector<1x32x16xf32>
    %38 = vector.shape_cast %37 : vector<1x32x16xf32> to vector<32x16xf32>
    %cst_19 = arith.constant dense<0.000000e+00> : vector<8x16xf32>
    %39 = tpu.matmul %7, %38, %cst_19 {dimension_numbers = #tpu.dot_dimension_numbers<[1], [0], [0], [1], [0, 0, 1, 1], [], []>} : vector<8x32xf32>, vector<32x16xf32>, vector<8x16xf32> -> vector<8x16xf32>
    %40 = arith.index_cast %c1_i32 : i32 to index
    %c0_20 = arith.constant 0 : index
    %c0_21 = arith.constant 0 : index
    %41 = vector.load %arg9[%40, %c0_20, %c0_21] : memref<2x8x16xf32, #tpu.memory_space<vmem>>, vector<1x8x16xf32>
    %42 = vector.shape_cast %41 : vector<1x8x16xf32> to vector<8x16xf32>
    %43 = arith.index_cast %c1_i32 : i32 to index
    %c0_22 = arith.constant 0 : index
    %c0_23 = arith.constant 0 : index
    %44 = vector.load %arg10[%43, %c0_22, %c0_23] : memref<2x8x16xf32, #tpu.memory_space<vmem>>, vector<1x8x16xf32>
    %45 = vector.shape_cast %44 : vector<1x8x16xf32> to vector<8x16xf32>
    %cst_24 = arith.constant dense<0.000000e+00> : vector<8x8xf32>
    %46 = tpu.matmul %39, %42, %cst_24 {dimension_numbers = #tpu.dot_dimension_numbers<[1], [1], [0], [0], [0, 0, 1, 0], [], []>} : vector<8x16xf32>, vector<8x16xf32>, vector<8x8xf32> -> vector<8x8xf32>
    %cst_25 = arith.constant dense<0xFF800000> : vector<8xf32>
    %47 = vector.multi_reduction <maximumf>, %46, %cst_25 [1] : vector<8x8xf32> to vector<8xf32>
    %48 = vector.shape_cast %47 : vector<8xf32> to vector<8x1xf32>
    %49 = vector.broadcast %48 : vector<8x1xf32> to vector<8x8xf32>
    %50 = arith.subf %46, %49 : vector<8x8xf32>
    %51 = math.exp %50 : vector<8x8xf32>
    %cst_26 = arith.constant dense<0.000000e+00> : vector<8xf32>
    %52 = vector.multi_reduction <add>, %51, %cst_26 [1] : vector<8x8xf32> to vector<8xf32>
    %53 = vector.shape_cast %52 : vector<8xf32> to vector<8x1xf32>
    %54 = tpu.reciprocal %53 {approx = true} : vector<8x1xf32> -> vector<8x1xf32>
    %55 = vector.broadcast %54 : vector<8x1xf32> to vector<8x8xf32>
    %56 = arith.mulf %51, %55 : vector<8x8xf32>
    %cst_27 = arith.constant dense<0.000000e+00> : vector<8x16xf32>
    %57 = tpu.matmul %56, %45, %cst_27 {dimension_numbers = #tpu.dot_dimension_numbers<[1], [0], [0], [1], [0, 0, 1, 1], [], []>} : vector<8x8xf32>, vector<8x16xf32>, vector<8x16xf32> -> vector<8x16xf32>
    %58 = arith.index_cast %c1_i32 : i32 to index
    %c0_28 = arith.constant 0 : index
    %c0_29 = arith.constant 0 : index
    %59 = vector.load %arg6[%58, %c0_28, %c0_29] : memref<2x16x32xf32, #tpu.memory_space<vmem>>, vector<1x16x32xf32>
    %60 = vector.shape_cast %59 : vector<1x16x32xf32> to vector<16x32xf32>
    %cst_30 = arith.constant dense<0.000000e+00> : vector<8x32xf32>
    %61 = tpu.matmul %57, %60, %cst_30 {dimension_numbers = #tpu.dot_dimension_numbers<[1], [0], [0], [1], [0, 0, 1, 1], [], []>} : vector<8x16xf32>, vector<16x32xf32>, vector<8x32xf32> -> vector<8x32xf32>
    %62 = arith.addf %35, %61 : vector<8x32xf32>
    %c2_i32 = arith.constant 2 : i32
    %c0_31 = arith.constant 0 : index
    %c0_32 = arith.constant 0 : index
    %63 = vector.load %arg7[%c0_31, %c0_32] : memref<1x32xf32, #tpu.memory_space<vmem>>, vector<1x32xf32>
    %64 = vector.broadcast %63 : vector<1x32xf32> to vector<8x32xf32>
    %65 = arith.addf %62, %64 : vector<8x32xf32>
    %c0_33 = arith.constant 0 : index
    %c0_34 = arith.constant 0 : index
    %c0_35 = arith.constant 0 : index
    %66 = vector.load %arg8[%c0_33, %c0_34, %c0_35] : memref<1x8x32xf32, #tpu.memory_space<vmem>>, vector<1x8x32xf32>
    %67 = vector.shape_cast %66 : vector<1x8x32xf32> to vector<8x32xf32>
    %68 = vector.shape_cast %65 : vector<8x32xf32> to vector<1x8x32xf32>
    tpu.vector_store %arg8[%c0_33, %c0_34, %c0_35], %68 {strides = array<i32>} : memref<1x8x32xf32, #tpu.memory_space<vmem>>, vector<1x8x32xf32>,
    return
  }
  func.func @transform_0(%arg0: i32, %arg1: i32) -> (i32, i32, i32) {
    %c0_i32 = arith.constant 0 : i32
    %c0_i32_0 = arith.constant 0 : i32
    %c0_i32_1 = arith.constant 0 : i32
    return %arg0, %c0_i32, %c0_i32_0 : i32, i32, i32
  }
  func.func @transform_1(%arg0: i32, %arg1: i32) -> (i32, i32, i32) {
    %c0_i32 = arith.constant 0 : i32
    %c0_i32_0 = arith.constant 0 : i32
    %c0_i32_1 = arith.constant 0 : i32
    %c0_i32_2 = arith.constant 0 : i32
    return %c0_i32, %c0_i32_0, %c0_i32_1 : i32, i32, i32
  }
  func.func @transform_2(%arg0: i32, %arg1: i32) -> (i32, i32, i32) {
    %c0_i32 = arith.constant 0 : i32
    %c0_i32_0 = arith.constant 0 : i32
    %c0_i32_1 = arith.constant 0 : i32
    %c0_i32_2 = arith.constant 0 : i32
    return %c0_i32, %c0_i32_0, %c0_i32_1 : i32, i32, i32
  }
  func.func @transform_3(%arg0: i32, %arg1: i32) -> (i32, i32, i32) {
    %c0_i32 = arith.constant 0 : i32
    %c0_i32_0 = arith.constant 0 : i32
    %c0_i32_1 = arith.constant 0 : i32
    %c0_i32_2 = arith.constant 0 : i32
    return %c0_i32, %c0_i32_0, %c0_i32_1 : i32, i32, i32
  }
  func.func @transform_4(%arg0: i32, %arg1: i32) -> (i32, i32, i32) {
    %c0_i32 = arith.constant 0 : i32
    %c0_i32_0 = arith.constant 0 : i32
    %c0_i32_1 = arith.constant 0 : i32
    %c0_i32_2 = arith.constant 0 : i32
    return %c0_i32, %c0_i32_0, %c0_i32_1 : i32, i32, i32
  }
  func.func @transform_5(%arg0: i32, %arg1: i32) -> (i32, i32) {
    %c0_i32 = arith.constant 0 : i32
    %c0_i32_0 = arith.constant 0 : i32
    %c0_i32_1 = arith.constant 0 : i32
    return %c0_i32, %c0_i32_0 : i32, i32
  }
  func.func @transform_6(%arg0: i32, %arg1: i32) -> (i32, i32, i32) {
    %c0_i32 = arith.constant 0 : i32
    %c0_i32_0 = arith.constant 0 : i32
    return %arg0, %arg1, %c0_i32 : i32, i32, i32
  }
}

</mosaic_0001>

<bundles_post_ra>
// kernel: tpu_custom_call.1
= control target key start
LH: loop header
LB: loop body
LE: loop exit
PB: predicated region body
PF: predicated region fallthrough
CT: control target
= control target key end

     0   :  { %11 = vsyncpa [#allocation5], 0  ;;  %s1942_s0 = inlined_call_operand.vmem [shape: f32[2,8,32], index: 0, kind: input, shape index: {}]   ;;  %s1943_s1 = inlined_call_operand.vmem [shape: f32[2,32,16], index: 1, kind: input, shape index: {}]   ;;  %s1944_s2 = inlined_call_operand.vmem [shape: f32[2,32,16], index: 2, kind: input, shape index: {}]   ;;  %s1945_s3 = inlined_call_operand.vmem [shape: f32[2,32,16], index: 3, kind: input, shape index: {}]   ;;  %s1946_s4 = inlined_call_operand.vmem [shape: f32[2,16,32], index: 4, kind: input, shape index: {}]   ;;  %s1947_s5 = inlined_call_operand.vmem [shape: f32[1,32], index: 5, kind: input, shape index: {}]   ;;  %s1948_s6 = inlined_call_operand.hbm [shape: f32[2,8,32], index: 6, kind: output, shape index: {}]  }
   0x1   :  { %13 = vsyncpa [#allocation5 + $0x1], 0  ;;  %s1669_s21 = smov 0   ;;  %s1671_s22 = smov 0  }
   0x2   :  { %s1673_s23 = smov 0   ;;  %s1675_s24 = smov 0  }
   0x3   :  { %s1677_s25 = smov 0   ;;  %s1679_s26 = smov 0  }
   0x4 LB: > { %s1304_s27 = sadd.s32 4294967295, %s1629_s26   ;;  %s1305_s28 = sadd.s32 4294967294, %s1629_s26   ;;  %s1629_s26 = sphi %s1679_s26, %s19_s26   ;;  %s1625_s25 = sphi %s1677_s25, %s1955_s25   ;;  %s1621_s24 = sphi %s1675_s24, %s1954_s24   ;;  %s1617_s23 = sphi %s1673_s23, %s1953_s23   ;;  %s1613_s22 = sphi %s1671_s22, %s1952_s22   ;;  %s1609_s21 = sphi %s1669_s21, %s1951_s21  }
   0x5   : > { %s31_s29 = sadd.s32 1, %s1625_s25  ;;  %s171_s30 = sadd.s32 1, %s1617_s23 }
   0x6   : > { %p33_p0 = scmp.ge.s32.totalorder %s31_s29, 2  ;;  %p181_p1 = scmp.ne.s32.totalorder %s1617_s23, %s1613_s22 }
   0x7   : > { %p182_p2 = scmp.eq.s32.totalorder %s1304_s27, 1  ;;  %p187_p3 = scmp.ne.s32.totalorder %s1613_s22, %s1609_s21 }
   0x8   : > { %s1957_s29 = smov (%p33_p0, %s31_s29), 0  ;;  %p188_p5 = scmp.eq.s32.totalorder %s1305_s28, 1 }
   0x9   : > { %p1709_p4 = por %p182_p2, %p181_p1  ;;  %s166_s8 = ssub.s32 %s1625_s25, %s1957_s29 }
   0xa   : > { %p1308_p6 = scmp.ge.s32.totalorder %s1629_s26, 1  ;;  %p169_p7 = scmp.eq.s32.totalorder %s166_s8, 0 }
   0xb   : > { %p1716_p8 = por %p188_p5, %p187_p3  ;;  %p228_p9 = scmp.lt.s32.totalorder %s1629_s26, 3 }
   0xc   : > { %s1722_s10 = scalar_select %p169_p7, %s1617_s23, %s171_s30  }
   0xd   : > { %p229_p10 = pnand %p1308_p6, %p228_p9 }
   0xe   : > { %p257_p11 = scmp.lt.s32.totalorder (!%p229_p10), %s1621_s24, 1  ;;  %s254_s16 = sand.u32 (!%p229_p10), 1, %s1613_s22  }
   0xf   : > { %232 = sbr.rel (%p229_p10) target bundleno = 1655 (0x677), region = 44  ;;  %s1309_s17 = sshll.u32 (!%p229_p10), %s254_s16, 3 }
  0x10   : > { %s1341_s20 = sshll.u32 (!%p229_p10), %s1621_s24, 7  ;;  %s256_s27 = scalar_lea.vmem (!%p229_p10), [#allocation4], %s1309_s17 }
  0x11   : > { %s1234_s28 = sshll.u32 (!%p229_p10), %s256_s27, 4  ;;  %s1232_s11 = scalar_lea.hbm (!%p229_p10), %s1948_s6, %s1341_s20  ;;  %s1235_s28 = int_to_ptr.vmem [resolvable:$true] %s1234_s28 }
  0x12   : > { %s1220_s12 = scalar_lea.sflag (!%p229_p10), [#allocation5], %s254_s16  ;;  %s1633_s14 = smov (!%p229_p10), [#allocation4]  }
  0x14   : > { %v269_v0 = vld [vmem:[%s1944_s2 + $0x18] sm:$0xff]  ;;  %v1631_v1 = vmov 0.0   ;;  %v268_v2 = vld [vmem:[%s1944_s2 + $0x10] sm:$0xff]  ;;  %vm1632_vm0 = vmmov 0   ;;  %s258_s15 = scalar_select %p257_p11, %s1621_s24, 1  ;;  %v267_v3 = vld [vmem:[%s1944_s2 + $0x8] sm:$0xff] }
  0x15   : > { %1388 = vmatprep.subr.mxu0 %v1631_v1  ;;  %1396 = vmatprep.mubr.msk.f32.mxu0 %vm1632_vm0, %v1631_v1  ;;  %v349_v4 = vld [vmem:[%s1945_s3 + $0x18] sm:$0xff]  ;;  %v348_v5 = vld [vmem:[%s1945_s3 + $0x10] sm:$0xff]  ;;  %v266_v6 = vld [vmem:[%s1944_s2] sm:$0xff]  ;;  %vm270_vm1 = vcmask 261120   ;;  %vm344_vm2 = vcmask 130048   ;;  %vm735_vm3 = vcmask 64512  }
  0x16   : > { %1389 = vmatpush3.msra.mxu0 %v269_v0  ;;  %1399 = vmatprep.subr.mxu1 %v1631_v1  ;;  %s1310_s18 = sshll.u32 %s258_s15, 3  ;;  %v1316_v8 = vld [vmem:[%s1944_s2 + $0x38] sm:$0xff]  ;;  %v347_v9 = vld [vmem:[%s1945_s3 + $0x8] sm:$0xff]  ;;  %v1315_v10 = vld [vmem:[%s1944_s2 + $0x30] sm:$0xff]  ;;  %s1557_s24 = sshll.u32 %s1633_s14, 4  ;;  %s1558_s24 = int_to_ptr.vmem [resolvable:$false] %s1557_s24 }
  0x17   : > { %1390 = vmatprep.subr.mxu0 %v1631_v1  ;;  %1407 = vmatprep.mubr.msk.f32.mxu1 %vm1632_vm0, %v1631_v1  ;;  %s260_s13 = scalar_lea.vmem %s1942_s0, %s1310_s18  ;;  %v1314_v11 = vld [vmem:[%s1944_s2 + $0x28] sm:$0xff]  ;;  %v1313_v12 = vld [vmem:[%s1944_s2 + $0x20] sm:$0xff]  ;;  %v581_v13 = vld [vmem:[%s1943_s1 + $0x18] sm:$0xff]  ;;  %s1559_s15 = scalar_lea.vmem %s1558_s24, 256 }
  0x18   : > { %1391 = vmatpush3.msra.mxu0 %v268_v2  ;;  %1400 = vmatpush3.msra.mxu1 %v349_v4  ;;  %v1755_v7 = vld [vmem:[%s260_s13] sm:$0xff]  ;;  %v580_v14 = vld [vmem:[%s1943_s1 + $0x10] sm:$0xff]  ;;  %v579_v15 = vld [vmem:[%s1943_s1 + $0x8] sm:$0xff]  ;;  %s1553_s13 = scalar_lea.vmem %s1235_s28, 128  ;;  %p1560_p1 = scmp.lt.s32.totalorder %s1235_s28, %s1558_s24 }
  0x19   : > { %1392 = vmatprep.subr.mxu0 %v1631_v1  ;;  %1401 = vmatprep.subr.mxu1 %v1631_v1  ;;  %v578_v16 = vld [vmem:[%s1943_s1] sm:$0xff]  ;;  %v1321_v18 = vld [vmem:[%s1945_s3 + $0x38] sm:$0xff]  ;;  %v1320_v19 = vld [vmem:[%s1945_s3 + $0x30] sm:$0xff]  ;;  %p1554_p12 = scmp.ne.s32.totalorder %s1235_s28, %s1553_s13  ;;  %p1561_p2 = scmp.lt.s32.totalorder %s1559_s15, %s1553_s13 }
  0x1a   : > { %1393 = vmatpush3.msra.mxu0 %v267_v3  ;;  %1402 = vmatpush3.msra.mxu1 %v348_v5  ;;  %v346_v17 = vld [vmem:[%s1945_s3] sm:$0xff]  ;;  %v1319_v20 = vld [vmem:[%s1945_s3 + $0x28] sm:$0xff]  ;;  %v1330_v34 = vld [vmem:[%s1943_s1 + $0x38] sm:$0xff] }
  0x1b   : > { %1394 = vmatprep.subr.mxu0 %v1631_v1  ;;  %1403 = vmatprep.subr.mxu1 %v1631_v1  ;;  %v1318_v21 = vld [vmem:[%s1945_s3 + $0x20] sm:$0xff]  ;;  %v1329_v35 = vld [vmem:[%s1943_s1 + $0x30] sm:$0xff]  ;;  %v1328_v36 = vld [vmem:[%s1943_s1 + $0x28] sm:$0xff]  ;;  %p1555_p13 = pnand %p1554_p12, %p1709_p4  ;;  %p1562_p3 = por %p1561_p2, %p1560_p1 }
  0x1c   : > { %1395 = vmatpush3.msra.mxu0 %v266_v6  ;;  %1404 = vmatpush3.msra.mxu1 %v347_v9  ;;  %v1327_v37 = vld [vmem:[%s1943_s1 + $0x20] sm:$0xff]  ;;  %v1336_v63 = vld [vmem:[%s1946_s4 + $0x18] sm:$0xff]  ;;  %v1335_v0 = vld [vmem:[%s1946_s4 + $0x10] sm:$0xff] }
  0x1d   : > { %1397 = vmatmul.mubr.msk.f32.vlgmr.msra.gmra.mxu0 %vm270_vm1, %v1755_v7  ;;  %1410 = vmatprep.subr.mxu0 %v1631_v1  ;;  %v821_v5 = vld [vmem:[%s1946_s4 + $0x8] sm:$0xff]  ;;  %v820_v6 = vld [vmem:[%s1946_s4] sm:$0xff]  ;;  %p1556_p0 = pneg %p1555_p13 }
  0x1e   : > { %1411 = vmatpush3.msra.mxu0 %v1316_v8  ;;  %1418 = vmatprep.mubr.msk.f32.mxu0 %vm1632_vm0, %v1631_v1 }
  0x1f   : > { %1412 = vmatprep.subr.mxu0 %v1631_v1  ;;  %1405 = vmatprep.subr.mxu1 %v1631_v1  ;;  %p1563_p5 = pnand %p1562_p3, %p1556_p0 }
  0x20   : > { %1413 = vmatpush3.msra.mxu0 %v1315_v10  ;;  %1406 = vmatpush3.msra.mxu1 %v346_v17 }
  0x21   : > { %1414 = vmatprep.subr.mxu0 %v1631_v1  ;;  %1421 = vmatprep.subr.mxu1 %v1631_v1 }
  0x22   : > { %1415 = vmatpush3.msra.mxu0 %v1314_v11  ;;  %1408 = vmatmul.mubr.msk.f32.vlgmr.msra.gmra.mxu1 %vm270_vm1, %v1755_v7 }
  0x23   : > { %1416 = vmatprep.subr.mxu0 %v1631_v1  ;;  %1422 = vmatpush3.msra.mxu1 %v1321_v18 }
  0x24   : > { %1417 = vmatpush3.msra.mxu0 %v1313_v12  ;;  %1429 = vmatprep.mubr.msk.f32.mxu1 %vm1632_vm0, %v1631_v1  ;;  %v1339_v12 = vld [vmem:[%s1947_s5] ss:$0 sm:$0xff] }
  0x25   : > { %1419 = vmatmul.mubr.msk.f32.vlgmr.msra.gmra.mxu0 %vm270_vm1, %v1755_v7  ;;  %1432 = vmatprep.subr.mxu0 %v1631_v1 }
  0x26   : > { %1433 = vmatpush3.msra.mxu0 %v581_v13  ;;  %1440 = vmatprep.mubr.msk.f32.mxu0 %vm1632_vm0, %v1631_v1 }
  0x27   : > { %1434 = vmatprep.subr.mxu0 %v1631_v1  ;;  %1423 = vmatprep.subr.mxu1 %v1631_v1 }
  0x28   : > { %1435 = vmatpush3.msra.mxu0 %v580_v14  ;;  %1424 = vmatpush3.msra.mxu1 %v1320_v19 }
  0x29   : > { %1436 = vmatprep.subr.mxu0 %v1631_v1  ;;  %1425 = vmatprep.subr.mxu1 %v1631_v1 }
  0x2a   : > { %1437 = vmatpush3.msra.mxu0 %v579_v15  ;;  %1426 = vmatpush3.msra.mxu1 %v1319_v20 }
  0x2b   : > { %1438 = vmatprep.subr.mxu0 %v1631_v1  ;;  %1427 = vmatprep.subr.mxu1 %v1631_v1 }
  0x2c   : > { %1439 = vmatpush3.msra.mxu0 %v578_v16  ;;  %1428 = vmatpush3.msra.mxu1 %v1318_v21 }
  0x2d   : > { %1441 = vmatmul.mubr.msk.f32.vlgmr.msra.gmra.mxu0 %vm270_vm1, %v1755_v7  ;;  %1453 = vmatprep.subr.mxu0 %v1631_v1 }
  0x2e   : > { %1461 = vmatprep.mubr.msk.f32.mxu0 %vm1632_vm0, %v1631_v1  ;;  %1443 = vmatprep.subr.mxu1 %v1631_v1 }
  0x2f   : > { %1430 = vmatmul.mubr.msk.f32.vlgmr.msra.gmra.mxu1 %vm270_vm1, %v1755_v7  ;;  %1454 = vmatpush3.msra.mxu0 %v1330_v34 }
  0x30   : > { %1445 = vmatprep.mubr.msk.f32.mxu1 %vm1632_vm0, %v1631_v1  ;;  %1455 = vmatprep.subr.mxu0 %v1631_v1 }
  0x31   : > { %1456 = vmatpush3.msra.mxu0 %v1329_v35 }
  0x32   : > { %1457 = vmatprep.subr.mxu0 %v1631_v1 }
  0x33   : > { %1458 = vmatpush3.msra.mxu0 %v1328_v36 }
  0x34   : > { %1459 = vmatprep.subr.mxu0 %v1631_v1 }
  0x35   : > { %1460 = vmatpush3.msra.mxu0 %v1327_v37 }
  0x36   : > { %1462 = vmatmul.mubr.msk.f32.vlgmr.msra.gmra.mxu0 %vm270_vm1, %v1755_v7  ;;  %1474 = vmatprep.subr.mxu0 %v1631_v1 }
  0x37   : > { %1478 = vmatprep.mubr.msk.f32.mxu0 %vm1632_vm0, %v1631_v1  ;;  %1475 = vmatpush3.msra.mxu0 %v1336_v63 }
  0x38   : > { %1476 = vmatprep.subr.mxu0 %v1631_v1 }
  0x39   : > { %1477 = vmatpush3.msra.mxu0 %v1335_v0 }
  0xdd   : > { %v340_v22 = vpop.f32.mrf.mxu0 }
  0xde   : > { %345 = vst.msk [vmem:[#allocation2] sm:$0xff] %vm344_vm2, %v340_v22 }
  0xdf   : > { %v1398_v23 = vpop.f32.mrf.mxu0 }
  0xe2   : > { %v416_v29 = vpop.f32.mrf.mxu1 }
  0xe3   : > { %420 = vst.msk [vmem:[#allocation3] sm:$0xff] %vm344_vm2, %v416_v29 }
  0xe4   : > { %v1409_v30 = vpop.f32.mrf.mxu1 }
  0xe5   : > { %v492_v24 = vpop.f32.mrf.mxu0  ;;  %v656_v25 = vld [vmem:[#allocation2] sm:$0xff] }
  0xe6   : > { %497 = vst.msk [vmem:[#allocation2 + $0x8] sm:$0xff] %vm344_vm2, %v492_v24  ;;  %1444 = vmatpush3.xpose.msk.msra.mxu1 %vm344_vm2, %v656_v25 }
  0xe7   : > { %v1420_v26 = vpop.f32.mrf.mxu0  ;;  %1448 = vmatprep.subr.mxu1 %v1631_v1 }
  0xea   : > { %v657_v32 = vld [vmem:[#allocation3] sm:$0xff] }
  0xed   : > { %v652_v27 = vpop.f32.mrf.mxu0  ;;  %v898_v51 = vld [vmem:[#allocation2 + $0x8] sm:$0xff] }
  0xee   : > { %1446 = vmatmul.mubr.msk.f32.vlgmr.msra.gmra.mxu1 %vm344_vm2, %v652_v27 }
  0xef   : > { %v1442_v28 = vpop.f32.mrf.mxu0  ;;  %1450 = vmatprep.mubr.msk.f32.mxu1 %vm1632_vm0, %v1631_v1  ;;  %v569_v31 = vpop.f32.mrf.mxu1  ;;  %1449 = vmatpush3.msra.mxu1 %v657_v32 }
  0xf0   : > { %574 = vst.msk [vmem:[#allocation3 + $0x8] sm:$0xff] %vm344_vm2, %v569_v31  ;;  %1464 = vmatprep.subr.mxu1 %v1631_v1 }
  0xf1   : > { %v1431_v33 = vpop.f32.mrf.mxu1 }
  0xf6   : > { %v893_v46 = vpop.f32.mrf.mxu0 }
  0xf7   : > { %v900_v52 = vld [vmem:[#allocation3 + $0x8] sm:$0xff] }
  0xf8   : > { %v1463_v47 = vpop.f32.mrf.mxu0 }
 0x1ae   : > { %v731_v38 = vpop.f32.mrf.mxu1 }
 0x1af   : > { %v736_v39 = vsel %vm735_vm3, %v731_v38, -inf }
 0x1b0   : > { %737 = vmax.xlane.f32.xlu0 %v736_v39  ;;  %v1447_v40 = vpop.f32.mrf.mxu1 }
 0x239   : > { %v738_v41 = vpop.xlane.xlu0 %737 }
 0x23a   : > { %v739_v42 = vsub.f32 %v731_v38, %v738_v41 }
 0x23c   : > { %v740_v43 = vmul.f32 1.442695, %v739_v42 }
 0x23e   : > { %1545 = vpow2.f32 %v740_v43 }
 0x24b   : > { %v1546_v44 = vpop.eup %1545 }
 0x24c   : > { %v742_v45 = vsel %vm735_vm3, %v1546_v44, 0.0 }
 0x24d   : > { %743 = vadd.xlane.f32.xlu0 %v742_v45 }
 0x2d6   : > { %v744_v48 = vpop.xlane.xlu0 %743 }
 0x2d7   : > { %1547 = vrcp.f32 %v744_v48 }
 0x2e4   : > { %v1548_v49 = vpop.eup %1547 }
 0x2e5   : > { %v746_v50 = vmul.f32 %v1548_v49, %v1546_v44 }
 0x2e7   : > { %1451 = vmatmul.mubr.msk.f32.vlgmr.msra.gmra.mxu1 %vm735_vm3, %v746_v50 }
 0x2e8   : > { %1465 = vmatpush3.xpose.msk.msra.mxu1 %vm344_vm2, %v898_v51  ;;  %1466 = vmatprep.mubr.msk.f32.mxu1 %vm1632_vm0, %v1631_v1 }
 0x2e9   : > { %1469 = vmatprep.subr.mxu1 %v1631_v1 }
 0x2eb   : > { %1467 = vmatmul.mubr.msk.f32.vlgmr.msra.gmra.mxu1 %vm344_vm2, %v893_v46 }
 0x2ec   : > { %1470 = vmatpush3.msra.mxu1 %v900_v52  ;;  %1471 = vmatprep.mubr.msk.f32.mxu1 %vm1632_vm0, %v1631_v1 }
 0x2ed   : > { %1481 = vmatprep.subr.mxu1 %v1631_v1 }
 0x3a7   : > { %v816_v53 = vpop.f32.mrf.mxu1 }
 0x3a9   : > { %v1452_v54 = vpop.f32.mrf.mxu1 }
 0x3ab   : > { %v973_v55 = vpop.f32.mrf.mxu1 }
 0x3ac   : > { %v977_v56 = vsel %vm735_vm3, %v973_v55, -inf }
 0x3ad   : > { %978 = vmax.xlane.f32.xlu1 %v977_v56  ;;  %v1468_v57 = vpop.f32.mrf.mxu1 }
 0x436   : > { %v979_v58 = vpop.xlane.xlu1 %978 }
 0x437   : > { %v980_v59 = vsub.f32 %v973_v55, %v979_v58 }
 0x439   : > { %v981_v60 = vmul.f32 1.442695, %v980_v59 }
 0x43b   : > { %1549 = vpow2.f32 %v981_v60 }
 0x448   : > { %v1550_v61 = vpop.eup %1549 }
 0x449   : > { %v983_v62 = vsel %vm735_vm3, %v1550_v61, 0.0 }
 0x44a   : > { %984 = vadd.xlane.f32.xlu1 %v983_v62 }
 0x4d3   : > { %v985_v2 = vpop.xlane.xlu1 %984 }
 0x4d4   : > { %1551 = vrcp.f32 %v985_v2 }
 0x4e1   : > { %v1552_v3 = vpop.eup %1551 }
 0x4e2   : > { %v987_v4 = vmul.f32 %v1552_v3, %v1550_v61 }
 0x4e4   : > { %1472 = vmatmul.mubr.msk.f32.vlgmr.msra.gmra.mxu1 %vm735_vm3, %v987_v4 }
 0x4e5   : > { %1482 = vmatpush3.msra.mxu1 %v821_v5  ;;  %1485 = vmatprep.mubr.msk.f32.mxu1 %vm1632_vm0, %v1631_v1 }
 0x4e6   : > { %1483 = vmatprep.subr.mxu1 %v1631_v1 }
 0x4e7   : > { %1484 = vmatpush3.msra.mxu1 %v820_v6 }
 0x4e8   : > { %1486 = vmatmul.mubr.msk.f32.vlgmr.msra.gmra.mxu1 %vm344_vm2, %v816_v53 }
 0x5a4   : > { %v1057_v7 = vpop.f32.mrf.mxu1 }
 0x5a5   : > { %1479 = vmatmul.mubr.msk.f32.vlgmr.msra.gmra.mxu0 %vm344_vm2, %v1057_v7 }
 0x5a6   : > { %v1473_v8 = vpop.f32.mrf.mxu1 }
 0x5a8   : > { %v1206_v9 = vpop.f32.mrf.mxu1 }
 0x5aa   : > { %v1487_v10 = vpop.f32.mrf.mxu1 }
 0x665   : > { %v1133_v11 = vpop.f32.mrf.mxu0 }
 0x666   : > { %v1207_v1 = vadd.f32 %v1206_v9, %v1133_v11 }
 0x667   : > { %v1480_v13 = vpop.f32.mrf.mxu0 }
 0x668   : > { %v1217_v14 = vadd.f32 %v1339_v12, %v1207_v1 }
 0x66a   : > { %1218 = vst.msk [vmem:[%s256_s27] sm:$0xff] %vm270_vm1, %v1217_v14 }
 0x66b   : > { %1566 = shalt.err (!%p1563_p5)
}
 0x66c   : > { %s1567_s17 = scalar_lea.hbm %s1232_s11, 128  ;;  %s1571_s19 = scalar_lea.hbm %s1948_s6, 256 }
 0x66d   : > { %p1568_p6 = scmp.ne.s32.totalorder %s1232_s11, %s1567_s17  ;;  %p1572_p10 = scmp.lt.s32.totalorder %s1232_s11, %s1948_s6 }
 0x66e   : > { %p1573_p11 = scmp.lt.s32.totalorder %s1571_s19, %s1567_s17 }
 0x66f   : > { %p1569_p7 = pnand %p1568_p6, %p1709_p4 }
 0x670   : > { %p1574_p12 = por %p1573_p11, %p1572_p10 }
 0x671   : > { %p1570_p9 = pneg %p1569_p7 }
 0x673   : > { %p1575_p13 = pnand %p1574_p12, %p1570_p9 }
 0x675   : > { %1578 = shalt.err (!%p1575_p13)
}
 0x676   : > { %1488 = dma.vmem_to_hbm [thread:$0]  (%p1709_p4), %s1235_s28, 128, %s1232_s11, %s1220_s12  }
 0x677 PF: > { %p1494_p0 = scmp.ge.s32.totalorder %s1629_s26, 2  ;;  %s1246_s30 = sand.u32 1, %s1609_s21  }
 0x678   : > { %s1247_s8 = scalar_lea.sflag [#allocation5], %s1246_s30 }
 0x679   : > { %p1491_p1 = pnand %p1494_p0, %p1716_p8 }
 0x67b   : > { %p1492_p2 = pneg %p1491_p1 }
 0x67d   : > { %1604 = dma.done.wait (%p1492_p2), %s1247_s8, 128  }
 0x67e   : > { %1606 = vsyncadd (%p1492_p2), %s1247_s8, 4294967168  ;;  %s19_s26 = sadd.s32 1, %s1629_s26   ;;  %s1951_s21 = smov %s1613_s22 }
 0x67f   : > { %p16_p3 = scmp.ge.s32.totalorder %s19_s26, 4   ;;  %s1952_s22 = smov %s1617_s23 }
 0x680   : > { %s1953_s23 = smov %s1722_s10  ;;  %s1954_s24 = smov %s1625_s25 }
 0x681   : > { %s1955_s25 = smov %s1957_s29  ;;  %18 = sbr.rel (!%p16_p3) target bundleno = 4 (0x4), region = 92 }
 0x686   :  { %1252 = vsyncpa [#allocation5], 1 }
 0x687   :  { %1254 = vsyncpa [#allocation5 + $0x1], 1 }

</bundles_post_ra>
